<compile_context>
chip_gen: v5e
topology: v5e:2x2
jax: 0.10.0
libtpu: 0.0.40
codegen_flags: <defaults>
</compile_context>

<pallas_src>
import functools

import jax
import jax.numpy as jnp
from jax.experimental import pallas as pl
from jax.experimental.pallas import tpu as pltpu

_LANE = 128     # vreg lane width   (last-dim granularity)
_SUBLANE = 8    # f32 sublane width (second-to-last-dim granularity)


def _round_up(x, m):
    return ((x + m - 1) // m) * m


def _vmem_tile_bytes(rows, cols, itemsize):
    # VMEM buffers are (8,128)-tiled, so narrow logical dims still occupy full tiles.
    return _round_up(max(rows, 1), _SUBLANE) * _round_up(max(cols, 1), _LANE) * itemsize


def _gaonet_kernel(nlayers, matmul_dtype, *refs):
    """refs = (x_ref, w1, b1, w2, b2, ..., wN, bN, out_ref).

    Processes one (TB, in_dim) batch tile per grid step entirely in VMEM:
    matmuls on the MXU (f32 accumulation), bias add + LeakyReLU(0.2) on the VPU.
    Hidden widths are padded to 128 lanes (weight-side only), so interior layers see
    full-lane operands; the in/out dims that touch HBM are left unpadded.
    """
    x_ref = refs[0]
    out_ref = refs[-1]
    param_refs = refs[1:-1]

    h = x_ref[...]                               # f32 tile straight from HBM
    for i in range(nlayers):
        w = param_refs[2 * i][...]               # (in_i, out_i), matmul_dtype
        b = param_refs[2 * i + 1][...]           # (1, out_i) f32, broadcasts over rows
        h = jnp.dot(h.astype(matmul_dtype), w,   # cast on the VPU (no wrapper HBM pass)
                    preferred_element_type=jnp.float32) + b
        if i < nlayers - 1:                      # LeakyReLU(0.2) after hidden Linears only
            h = jnp.maximum(h, 0.2 * h)          # single vmax (alpha < 1)
    out_ref[...] = h.astype(out_ref.dtype)


def gaonet_forward(x, weights, biases, *, use_bf16=False, batch_tile=None):
    """GaoNet forward.

    x: (B, lyrs[0]) f32.
    weights[i]: (lyrs[i], lyrs[i+1])  (already transposed for x @ W).
    biases[i]:  (1, lyrs[i+1]).
    use_bf16:   cast matmul operands to bf16 inside the kernel (f32 accumulation).
    batch_tile: optional batch tile override (rounded to a multiple of 8).
    """
    nlayers = len(weights)
    B, in_dim = x.shape
    out_dim = weights[-1].shape[1]

    matmul_dtype = jnp.bfloat16 if use_bf16 else jnp.float32
    w_itemsize = jnp.dtype(matmul_dtype).itemsize

    # Pad ONLY the hidden (interior) widths to 128 lanes.  The padding lives on the tiny
    # weight/bias tensors; x's in_dim and the final out_dim (both HBM-facing) stay exact.
    dims = [in_dim] + [w.shape[1] for w in weights]
    pdims = [in_dim] + [_round_up(d, _LANE) for d in dims[1:-1]] + [out_dim]

    # Batch tile: multiple of 8 sublanes (or the full batch if B <= 8).  Aim for >= ~4
    # grid steps so the v7x megacore + double-buffered pipeline have work to overlap,
    # but allow up to 4096 rows/step for large batches to amortize per-step overhead.
    if B <= _SUBLANE:
        TB = B
    else:
        max_full = (B // _SUBLANE) * _SUBLANE
        if batch_tile is not None:
            TB = min(_round_up(batch_tile, _SUBLANE), max_full)
        else:
            TB = min(4096, _round_up(pl.cdiv(B, 4), _SUBLANE), max_full)
        TB = max(TB, _SUBLANE)
    num_tiles = pl.cdiv(B, TB)

    # Pad (and optionally narrow) the tiny parameter tensors only.  Zero-padded weight
    # rows/cols and bias entries keep the padded activation columns exactly zero through
    # LeakyReLU and later layers, so results are identical to the unpadded math.
    w_p, b_p = [], []
    for i, (w, b) in enumerate(zip(weights, biases)):
        w_p.append(jnp.pad(w.astype(matmul_dtype),
                           ((0, pdims[i] - w.shape[0]), (0, pdims[i + 1] - w.shape[1]))))
        b_p.append(jnp.pad(b.astype(jnp.float32), ((0, 0), (0, pdims[i + 1] - b.shape[1]))))

    # BlockSpecs: x/out stream along the batch grid axis (unpadded feature dims — last
    # block dim equals the full array dim, so the (8,128) rule is satisfied); weights and
    # biases use constant index_maps -> DMA'd once, resident in VMEM for the whole grid.
    in_specs = [pl.BlockSpec((TB, in_dim), lambda i: (i, 0))]
    args = [x]
    for li in range(nlayers):
        in_specs.append(pl.BlockSpec((pdims[li], pdims[li + 1]), lambda i: (0, 0)))
        in_specs.append(pl.BlockSpec((1, pdims[li + 1]), lambda i: (0, 0)))
        args.append(w_p[li])
        args.append(b_p[li])
    out_spec = pl.BlockSpec((TB, out_dim), lambda i: (i, 0))

    # Scoped-VMEM estimate using physical (8,128)-tiled footprints: double-buffered x/out
    # tiles, live f32 activation tiles, and the resident (default double-buffered; the
    # pipeline allocates 2x even for constant index_maps) weights + biases.
    vmem_bytes = 2 * _vmem_tile_bytes(TB, in_dim, 4)
    vmem_bytes += 2 * _vmem_tile_bytes(TB, out_dim, 4)
    vmem_bytes += 2 * _vmem_tile_bytes(TB, max(pdims), 4)
    vmem_bytes += sum(2 * _vmem_tile_bytes(pdims[i], pdims[i + 1], w_itemsize)
                      + 2 * _vmem_tile_bytes(1, pdims[i + 1], 4)
                      for i in range(nlayers))
    try:  # generation-aware cap (v7x has 64 MiB/TC vs 128 MiB on v5e/v6e)
        vmem_cap = int(pltpu.get_tpu_info().vmem_capacity_bytes)
    except Exception:
        vmem_cap = 64 << 20
    vmem_limit = int(min(max(2 * vmem_bytes, 8 << 20), min(32 << 20, vmem_cap // 2)))

    # Advisory cost: true HBM bytes (x + out + params) and the actual MXU flops.
    flops = 2 * B * sum(pdims[i] * pdims[i + 1] for i in range(nlayers))
    bytes_accessed = (B * in_dim * 4 + B * out_dim * 4
                      + sum(int(w.size) * w_itemsize for w in w_p)
                      + sum(int(b.size) * 4 for b in b_p))
    cost = pl.CostEstimate(flops=int(flops), transcendentals=0,
                           bytes_accessed=int(bytes_accessed))

    kernel = functools.partial(_gaonet_kernel, nlayers, matmul_dtype)
    return pl.pallas_call(
        kernel,
        out_shape=jax.ShapeDtypeStruct((B, out_dim), jnp.float32),
        grid=(num_tiles,),
        in_specs=in_specs,
        out_specs=out_spec,
        compiler_params=pltpu.CompilerParams(
            dimension_semantics=("parallel",),   # batch axis -> megacore sharding on v7x
            vmem_limit_bytes=vmem_limit,
        ),
        cost_estimate=cost,
    )(*args)


def init_gaonet_params(key, lyrs):
    """Deterministic PyTorch-style init: U(-1/sqrt(fan_in), 1/sqrt(fan_in))."""
    weights, biases = [], []
    for i in range(len(lyrs) - 1):
        fan_in, fan_out = lyrs[i], lyrs[i + 1]
        key, kw, kb = jax.random.split(key, 3)
        bound = 1.0 / jnp.sqrt(fan_in)
        # Stored already transposed to (in, out) for x @ W.
        w = jax.random.uniform(kw, (fan_in, fan_out), jnp.float32, -bound, bound)
        b = jax.random.uniform(kb, (1, fan_out), jnp.float32, -bound, bound)
        weights.append(w)
        biases.append(b)
    return weights, biases


def gaonet_reference(x, weights, biases):
    """Pure-JAX reference mirroring the PyTorch forward."""
    h = x
    n = len(weights)
    for i, (w, b) in enumerate(zip(weights, biases)):
        h = h @ w + b
        if i < n - 1:
            h = jnp.where(h > 0, h, 0.2 * h)
    return h


if __name__ == "__main__":
    # GaoNet(lyrs=[16, 32, 32, 8]): two hidden Linear+LeakyReLU(0.2), final Linear.
    # (dropout=None, bn=False -> no dropout / batchnorm layers.)
    lyrs = [16, 32, 32, 8]
    batch = 2

    key = jax.random.PRNGKey(0)
    key, kx = jax.random.split(key)
    x = jax.random.normal(kx, (batch, lyrs[0]), jnp.float32)
    weights, biases = init_gaonet_params(key, lyrs)

    y_ref = gaonet_reference(x, weights, biases)

    # f32 MXU path (exact vs reference), tiny batch -> single (2, 16) tile.
    y = jax.block_until_ready(gaonet_forward(x, weights, biases))
    assert y.shape == (batch, lyrs[-1])
    assert jnp.allclose(y, y_ref, atol=1e-5, rtol=1e-5), "f32 mismatch vs reference"

    # bf16-matmul path (in-kernel VPU cast of x; f32 accumulation + f32 elementwise).
    y_bf16 = jax.block_until_ready(gaonet_forward(x, weights, biases, use_bf16=True))
    assert y_bf16.shape == (batch, lyrs[-1])
    assert jnp.allclose(y_bf16, y_ref, atol=5e-2, rtol=5e-2), "bf16 mismatch vs reference"

    # Larger batch exercising the pipelined grid with a partial boundary block
    # (B=300, explicit tile 128 -> grid of 3 with a 44-row edge tile).
    key, kx2 = jax.random.split(key)
    x_big = jax.random.normal(kx2, (300, lyrs[0]), jnp.float32)
    y_big_ref = gaonet_reference(x_big, weights, biases)
    y_big = jax.block_until_ready(gaonet_forward(x_big, weights, biases, batch_tile=128))
    assert y_big.shape == (300, lyrs[-1])
    assert jnp.allclose(y_big, y_big_ref, atol=1e-5, rtol=1e-5), "tiled mismatch vs reference"

    # Default tile heuristic: >= 4 grid steps for moderate batches (80-row tiles here),
    # also ending in a partial boundary block.
    y_auto = jax.block_until_ready(gaonet_forward(x_big, weights, biases))
    assert y_auto.shape == (300, lyrs[-1])
    assert jnp.allclose(y_auto, y_big_ref, atol=1e-5, rtol=1e-5), "auto-tile mismatch vs reference"

    print("KERNEL_OK")
</pallas_src>

<mosaic_0001>
module attributes {stable_mosaic.version = 11 : i64} {
  func.func @_gaonet_kernel(%arg0: i32, %arg1: memref<2x16xf32, #tpu.memory_space<vmem>>, %arg2: memref<16x128xf32, #tpu.memory_space<vmem>>, %arg3: memref<1x128xf32, #tpu.memory_space<vmem>>, %arg4: memref<128x128xf32, #tpu.memory_space<vmem>>, %arg5: memref<1x128xf32, #tpu.memory_space<vmem>>, %arg6: memref<128x8xf32, #tpu.memory_space<vmem>>, %arg7: memref<1x8xf32, #tpu.memory_space<vmem>>, %arg8: memref<2x8xf32, #tpu.memory_space<vmem>>) attributes {dimension_semantics = [#tpu.dimension_semantics<parallel>], iteration_bounds = array<i64: 1>, scalar_prefetch = 0 : i64, scratch_operands = 0 : i64, tpu.core_type = #tpu.core_type<tc>, window_params = [{transform_indices = @transform_0, window_bounds = array<i64: 2, 16>}, {pipeline_mode = #tpu.pipeline_mode<synchronous>, transform_indices = @transform_1, window_bounds = array<i64: 16, 128>}, {pipeline_mode = #tpu.pipeline_mode<synchronous>, transform_indices = @transform_2, window_bounds = array<i64: 1, 128>}, {pipeline_mode = #tpu.pipeline_mode<synchronous>, transform_indices = @transform_3, window_bounds = array<i64: 128, 128>}, {pipeline_mode = #tpu.pipeline_mode<synchronous>, transform_indices = @transform_4, window_bounds = array<i64: 1, 128>}, {pipeline_mode = #tpu.pipeline_mode<synchronous>, transform_indices = @transform_5, window_bounds = array<i64: 128, 8>}, {pipeline_mode = #tpu.pipeline_mode<synchronous>, transform_indices = @transform_6, window_bounds = array<i64: 1, 8>}, {transform_indices = @transform_7, window_bounds = array<i64: 2, 8>}]} {
    %c0 = arith.constant 0 : index
    %c0_0 = arith.constant 0 : index
    %0 = vector.load %arg1[%c0, %c0_0] : memref<2x16xf32, #tpu.memory_space<vmem>>, vector<2x16xf32>
    %c0_1 = arith.constant 0 : index
    %c0_2 = arith.constant 0 : index
    %1 = vector.load %arg2[%c0_1, %c0_2] : memref<16x128xf32, #tpu.memory_space<vmem>>, vector<16x128xf32>
    %c0_3 = arith.constant 0 : index
    %c0_4 = arith.constant 0 : index
    %2 = vector.load %arg3[%c0_3, %c0_4] : memref<1x128xf32, #tpu.memory_space<vmem>>, vector<1x128xf32>
    %cst = arith.constant dense<0.000000e+00> : vector<2x128xf32>
    %3 = tpu.matmul %0, %1, %cst {dimension_numbers = #tpu.dot_dimension_numbers<[1], [0], [0], [1], [0, 0, 1, 1], [], []>} : vector<2x16xf32>, vector<16x128xf32>, vector<2x128xf32> -> vector<2x128xf32>
    %4 = vector.broadcast %2 : vector<1x128xf32> to vector<2x128xf32>
    %5 = arith.addf %3, %4 : vector<2x128xf32>
    %cst_5 = arith.constant 2.000000e-01 : f32
    %6 = vector.broadcast %cst_5 : f32 to vector<2x128xf32>
    %7 = arith.mulf %6, %5 : vector<2x128xf32>
    %8 = arith.maximumf %5, %7 : vector<2x128xf32>
    %c0_6 = arith.constant 0 : index
    %c0_7 = arith.constant 0 : index
    %9 = vector.load %arg4[%c0_6, %c0_7] : memref<128x128xf32, #tpu.memory_space<vmem>>, vector<128x128xf32>
    %c0_8 = arith.constant 0 : index
    %c0_9 = arith.constant 0 : index
    %10 = vector.load %arg5[%c0_8, %c0_9] : memref<1x128xf32, #tpu.memory_space<vmem>>, vector<1x128xf32>
    %cst_10 = arith.constant dense<0.000000e+00> : vector<2x128xf32>
    %11 = tpu.matmul %8, %9, %cst_10 {dimension_numbers = #tpu.dot_dimension_numbers<[1], [0], [0], [1], [0, 0, 1, 1], [], []>} : vector<2x128xf32>, vector<128x128xf32>, vector<2x128xf32> -> vector<2x128xf32>
    %12 = vector.broadcast %10 : vector<1x128xf32> to vector<2x128xf32>
    %13 = arith.addf %11, %12 : vector<2x128xf32>
    %cst_11 = arith.constant 2.000000e-01 : f32
    %14 = vector.broadcast %cst_11 : f32 to vector<2x128xf32>
    %15 = arith.mulf %14, %13 : vector<2x128xf32>
    %16 = arith.maximumf %13, %15 : vector<2x128xf32>
    %c0_12 = arith.constant 0 : index
    %c0_13 = arith.constant 0 : index
    %17 = vector.load %arg6[%c0_12, %c0_13] : memref<128x8xf32, #tpu.memory_space<vmem>>, vector<128x8xf32>
    %c0_14 = arith.constant 0 : index
    %c0_15 = arith.constant 0 : index
    %18 = vector.load %arg7[%c0_14, %c0_15] : memref<1x8xf32, #tpu.memory_space<vmem>>, vector<1x8xf32>
    %cst_16 = arith.constant dense<0.000000e+00> : vector<2x8xf32>
    %19 = tpu.matmul %16, %17, %cst_16 {dimension_numbers = #tpu.dot_dimension_numbers<[1], [0], [0], [1], [0, 0, 1, 1], [], []>} : vector<2x128xf32>, vector<128x8xf32>, vector<2x8xf32> -> vector<2x8xf32>
    %20 = vector.broadcast %18 : vector<1x8xf32> to vector<2x8xf32>
    %21 = arith.addf %19, %20 : vector<2x8xf32>
    %c0_17 = arith.constant 0 : index
    %c0_18 = arith.constant 0 : index
    %22 = vector.load %arg8[%c0_17, %c0_18] : memref<2x8xf32, #tpu.memory_space<vmem>>, vector<2x8xf32>
    tpu.vector_store %arg8[%c0_17, %c0_18], %21 {strides = array<i32>} : memref<2x8xf32, #tpu.memory_space<vmem>>, vector<2x8xf32>,
    return
  }
  func.func @transform_0(%arg0: i32) -> (i32, i32) {
    %c0_i32 = arith.constant 0 : i32
    %c0_i32_0 = arith.constant 0 : i32
    return %arg0, %c0_i32 : i32, i32
  }
  func.func @transform_1(%arg0: i32) -> (i32, i32) {
    %c0_i32 = arith.constant 0 : i32
    %c0_i32_0 = arith.constant 0 : i32
    %c0_i32_1 = arith.constant 0 : i32
    return %c0_i32, %c0_i32_0 : i32, i32
  }
  func.func @transform_2(%arg0: i32) -> (i32, i32) {
    %c0_i32 = arith.constant 0 : i32
    %c0_i32_0 = arith.constant 0 : i32
    %c0_i32_1 = arith.constant 0 : i32
    return %c0_i32, %c0_i32_0 : i32, i32
  }
  func.func @transform_3(%arg0: i32) -> (i32, i32) {
    %c0_i32 = arith.constant 0 : i32
    %c0_i32_0 = arith.constant 0 : i32
    %c0_i32_1 = arith.constant 0 : i32
    return %c0_i32, %c0_i32_0 : i32, i32
  }
  func.func @transform_4(%arg0: i32) -> (i32, i32) {
    %c0_i32 = arith.constant 0 : i32
    %c0_i32_0 = arith.constant 0 : i32
    %c0_i32_1 = arith.constant 0 : i32
    return %c0_i32, %c0_i32_0 : i32, i32
  }
  func.func @transform_5(%arg0: i32) -> (i32, i32) {
    %c0_i32 = arith.constant 0 : i32
    %c0_i32_0 = arith.constant 0 : i32
    %c0_i32_1 = arith.constant 0 : i32
    return %c0_i32, %c0_i32_0 : i32, i32
  }
  func.func @transform_6(%arg0: i32) -> (i32, i32) {
    %c0_i32 = arith.constant 0 : i32
    %c0_i32_0 = arith.constant 0 : i32
    %c0_i32_1 = arith.constant 0 : i32
    return %c0_i32, %c0_i32_0 : i32, i32
  }
  func.func @transform_7(%arg0: i32) -> (i32, i32) {
    %c0_i32 = arith.constant 0 : i32
    %c0_i32_0 = arith.constant 0 : i32
    return %arg0, %c0_i32 : i32, i32
  }
}

</mosaic_0001>

<bundles_post_ra>
// kernel: tpu_custom_call.1
= control target key start
LH: loop header
LB: loop body
LE: loop exit
PB: predicated region body
PF: predicated region fallthrough
CT: control target
= control target key end

     0   :  { %12 = vsyncpa [#allocation3], 0  ;;  %s395_s0 = inlined_call_operand.vmem [shape: f32[2,16], index: 0, kind: input, shape index: {}]   ;;  %s396_s1 = inlined_call_operand.hbm [shape: f32[16,128], index: 1, kind: input, shape index: {}]   ;;  %s397_s2 = inlined_call_operand.vmem [shape: f32[1,128], index: 2, kind: input, shape index: {}]   ;;  %s398_s3 = inlined_call_operand.vmem [shape: f32[128,128], index: 3, kind: input, shape index: {}]   ;;  %s399_s4 = inlined_call_operand.vmem [shape: f32[1,128], index: 4, kind: input, shape index: {}]   ;;  %s400_s5 = inlined_call_operand.vmem [shape: f32[128,8], index: 5, kind: input, shape index: {}]   ;;  %s401_s6 = inlined_call_operand.vmem [shape: f32[1,8], index: 6, kind: input, shape index: {}]   ;;  %s402_s7 = inlined_call_operand.hbm [shape: f32[2,8], index: 7, kind: output, shape index: {}]  }
   0x1   :  { %13 = vsyncpa [#allocation4], 0  ;;  %s20_s26 = sshll.u32 %s396_s1, 4  ;;  %s237_s27 = smov [#allocation2]   ;;  %s21_s26 = int_to_ptr.hbm [resolvable:$true] %s20_s26 }
   0x2   :  { %s22_s28 = sshll.u32 %s237_s27, 4  ;;  %s238_s29 = smov 128   ;;  %s23_s28 = int_to_ptr.vmem [resolvable:$true] %s22_s28 }
   0x3   :  { %s239_s30 = smov 8  }
   0x4   :  { %28 = dma.hbm_to_vmem [thread:$0]  %s21_s26, 256, %s23_s28, [#allocation3], %s238_s29, %s238_s29, %s239_s30  }
   0x5   :  { %233 = dma.done.wait [#allocation3], 256  }
   0x6   :  { %234 = vsyncadd [#allocation3], 4294967040  ;;  %v45_v0 = vld [vmem:[#allocation2 + $0x8] sm:$0xff]  ;;  %v44_v1 = vld [vmem:[#allocation2] sm:$0xff]  ;;  %vm50_vm0 = vcmask 130048   ;;  %s240_s25 = smov [#allocation5]  }
   0x7   :  { %68 = vmatpush.msra.mxu0 %v45_v0  ;;  %v43_v2 = vld [vmem:[%s395_s0] sm:$0x3]  ;;  %v91_v3 = vld [vmem:[%s398_s3 + $0x78] sm:$0xff]  ;;  %v90_v4 = vld [vmem:[%s398_s3 + $0x70] sm:$0xff]  ;;  %s165_s26 = sshll.u32 %s240_s25, 4  ;;  %vm158_vm1 = vcmask 58368   ;;  %s166_s26 = int_to_ptr.vmem [resolvable:$true] %s165_s26 }
   0x8   :  { %96 = vmatpush.msra.mxu1 %v91_v3  ;;  %v89_v5 = vld [vmem:[%s398_s3 + $0x68] sm:$0xff]  ;;  %v88_v6 = vld [vmem:[%s398_s3 + $0x60] sm:$0xff]  ;;  %v87_v7 = vld [vmem:[%s398_s3 + $0x58] sm:$0xff] }
   0x9   :  { %69 = vmatpush.msra.mxu0 %v44_v1  ;;  %v86_v8 = vld [vmem:[%s398_s3 + $0x50] sm:$0xff]  ;;  %v85_v9 = vld [vmem:[%s398_s3 + $0x48] sm:$0xff]  ;;  %v84_v10 = vld [vmem:[%s398_s3 + $0x40] sm:$0xff] }
   0xa   :  { %177 = vmatmul.msk.f32.vlgmr.msra.gmra.mxu0 %vm50_vm0, %v43_v2  ;;  %97 = vmatpush.msra.mxu1 %v90_v4  ;;  %v83_v11 = vld [vmem:[%s398_s3 + $0x38] sm:$0xff]  ;;  %v82_v12 = vld [vmem:[%s398_s3 + $0x30] sm:$0xff]  ;;  %v81_v13 = vld [vmem:[%s398_s3 + $0x28] sm:$0xff] }
   0xb   :  { %v80_v14 = vld [vmem:[%s398_s3 + $0x20] sm:$0xff]  ;;  %v79_v15 = vld [vmem:[%s398_s3 + $0x18] sm:$0xff]  ;;  %v78_v16 = vld [vmem:[%s398_s3 + $0x10] sm:$0xff] }
   0xc   :  { %98 = vmatpush.msra.mxu1 %v89_v5  ;;  %v77_v17 = vld [vmem:[%s398_s3 + $0x8] sm:$0xff]  ;;  %v76_v18 = vld [vmem:[%s398_s3] sm:$0xff]  ;;  %v133_v19 = vld [vmem:[%s400_s5 + $0x78] sm:$0xff] }
   0xd   :  { %v132_v20 = vld [vmem:[%s400_s5 + $0x70] sm:$0xff]  ;;  %138 = vmatpush.msra.mxu2 %v133_v19  ;;  %v131_v21 = vld [vmem:[%s400_s5 + $0x68] sm:$0xff]  ;;  %v130_v22 = vld [vmem:[%s400_s5 + $0x60] sm:$0xff] }
   0xe   :  { %99 = vmatpush.msra.mxu1 %v88_v6  ;;  %v129_v23 = vld [vmem:[%s400_s5 + $0x58] sm:$0xff]  ;;  %v128_v24 = vld [vmem:[%s400_s5 + $0x50] sm:$0xff]  ;;  %v127_v25 = vld [vmem:[%s400_s5 + $0x48] sm:$0xff] }
   0xf   :  { %139 = vmatpush.msra.mxu2 %v132_v20  ;;  %v126_v26 = vld [vmem:[%s400_s5 + $0x40] sm:$0xff]  ;;  %v125_v27 = vld [vmem:[%s400_s5 + $0x38] sm:$0xff]  ;;  %v124_v28 = vld [vmem:[%s400_s5 + $0x30] sm:$0xff] }
  0x10   :  { %100 = vmatpush.msra.mxu1 %v87_v7  ;;  %v123_v29 = vld [vmem:[%s400_s5 + $0x28] sm:$0xff]  ;;  %v122_v30 = vld [vmem:[%s400_s5 + $0x20] sm:$0xff]  ;;  %v121_v36 = vld [vmem:[%s400_s5 + $0x18] sm:$0xff] }
  0x11   :  { %140 = vmatpush.msra.mxu2 %v131_v21  ;;  %v182_v31 = vld [vmem:[%s397_s2] ss:$0 sm:$0xff]  ;;  %v120_v37 = vld [vmem:[%s400_s5 + $0x10] sm:$0xff]  ;;  %v119_v38 = vld [vmem:[%s400_s5 + $0x8] sm:$0xff] }
  0x12   :  { %101 = vmatpush.msra.mxu1 %v86_v8  ;;  %v118_v39 = vld [vmem:[%s400_s5] sm:$0xff]  ;;  %s167_s5 = sshll.u32 %s402_s7, 4  ;;  %s168_s5 = int_to_ptr.hbm [resolvable:$true] %s167_s5 }
  0x13   :  { %141 = vmatpush.msra.mxu2 %v130_v22  ;;  %v183_v40 = vld [vmem:[%s399_s4] ss:$0 sm:$0xff] }
  0x14   :  { %102 = vmatpush.msra.mxu1 %v85_v9  ;;  %v184_v45 = vld [vmem:[%s401_s6] ss:$0 sm:$0xff] }
  0x15   :  { %142 = vmatpush.msra.mxu2 %v129_v23 }
  0x16   :  { %103 = vmatpush.msra.mxu1 %v84_v10 }
  0x17   :  { %143 = vmatpush.msra.mxu2 %v128_v24 }
  0x18   :  { %104 = vmatpush.msra.mxu1 %v83_v11 }
  0x19   :  { %144 = vmatpush.msra.mxu2 %v127_v25 }
  0x1a   :  { %105 = vmatpush.msra.mxu1 %v82_v12 }
  0x1b   :  { %145 = vmatpush.msra.mxu2 %v126_v26 }
  0x1c   :  { %106 = vmatpush.msra.mxu1 %v81_v13 }
  0x1d   :  { %146 = vmatpush.msra.mxu2 %v125_v27 }
  0x1e   :  { %107 = vmatpush.msra.mxu1 %v80_v14 }
  0x1f   :  { %147 = vmatpush.msra.mxu2 %v124_v28 }
  0x20   :  { %108 = vmatpush.msra.mxu1 %v79_v15 }
  0x21   :  { %148 = vmatpush.msra.mxu2 %v123_v29 }
  0x22   :  { %109 = vmatpush.msra.mxu1 %v78_v16 }
  0x23   :  { %149 = vmatpush.msra.mxu2 %v122_v30 }
  0x24   :  { %110 = vmatpush.msra.mxu1 %v77_v17 }
  0x25   :  { %150 = vmatpush.msra.mxu2 %v121_v36 }
  0x26   :  { %111 = vmatpush.msra.mxu1 %v76_v18 }
  0x27   :  { %151 = vmatpush.msra.mxu2 %v120_v37 }
  0x29   :  { %152 = vmatpush.msra.mxu2 %v119_v38 }
  0x2b   :  { %153 = vmatpush.msra.mxu2 %v118_v39 }
  0x87   :  { %v71_v32 = vpop.f32.mrf.mxu0 }
  0x88   :  { %v72_v33 = vadd.f32 %v182_v31, %v71_v32 }
  0x8a   :  { %v74_v34 = vmul.f32 0.2, %v72_v33 }
  0x8c   :  { %v75_v35 = vmax.f32 %v72_v33, %v74_v34 }
  0x8e   :  { %112 = vmatmul.f32.vlgmr.msra.gmra.mxu1 %v75_v35 }
 0x10b   :  { %v113_v41 = vpop.f32.mrf.mxu1 }
 0x10c   :  { %v114_v42 = vadd.f32 %v183_v40, %v113_v41 }
 0x10e   :  { %v116_v43 = vmul.f32 0.2, %v114_v42 }
 0x110   :  { %v117_v44 = vmax.f32 %v114_v42, %v116_v43 }
 0x112   :  { %154 = vmatmul.f32.vlgmr.msra.gmra.mxu2 %v117_v44 }
 0x195   :  { %v155_v46 = vpop.f32.mrf.mxu2 }
 0x196   :  { %v156_v47 = vadd.f32 %v184_v45, %v155_v46 }
 0x198   :  { %159 = vst.msk [vmem:[#allocation5] sm:$0x3] %vm158_vm1, %v156_v47 }
 0x199   :  { %170 = dma.vmem_to_hbm [thread:$0]  %s166_s26, 32, %s168_s5, [#allocation4]  }
 0x19a   :  { %235 = dma.done.wait [#allocation4], 32  }
 0x19b   :  { %236 = vsyncadd [#allocation4], 4294967264 }
 0x19c   :  { %175 = vsyncpa [#allocation3], 1 }
 0x19d   :  { %176 = vsyncpa [#allocation4], 1 }

</bundles_post_ra>
